<compile_context>
chip_gen: v7x
topology: tpu7x:2x2x1
jax: 0.10.0
libtpu: 0.0.40
codegen_flags: <defaults>
</compile_context>

<pallas_src>
import math
from functools import partial

import jax
import jax.numpy as jnp
from jax.experimental import pallas as pl
from jax.experimental.pallas import tpu as pltpu


def _rel_pos_bias_kernel(wt_ref, out_ref, *, num_buckets, max_distance, dpad):
    """wt_ref : (heads, num_buckets) f32 embedding table (transposed).
       out_ref: (heads, TQ, TK)      output tile.
    """
    heads, tq, tk = out_ref.shape
    i0 = pl.program_id(0) * tq          # first query index of this tile
    j0 = pl.program_id(1) * tk          # first key index of this tile

    # ---- Toeplitz slab: one entry per distinct rel = j - i in this tile. ----
    # Slab index d in [0, dpad); rel(d) = d - tq + (j0 - i0).  The tile only
    # uses d = (j - i) + tq in [1, tq+tk-1]; padding entries are harmless.
    d = jax.lax.broadcasted_iota(jnp.int32, (1, dpad), 1)
    rel = d + (j0 - i0 - tq)                                   # (1, dpad) int32

    # ---- T5 relative-position bucketing (same result as the PyTorch code) ----
    nrel = -rel
    nb_half = num_buckets // 2
    ret = jnp.where(nrel < 0, jnp.int32(nb_half), jnp.int32(0))
    nabs = jnp.abs(nrel)                                       # == |rel|
    max_exact = nb_half // 2
    is_small = nabs < max_exact

    # frac = log(|rel|/max_exact)/log(max_distance/max_exact)*(nb_half-max_exact)
    # with the constant divisions folded into c1/c0:  frac = log(safe)*c1 + c0.
    c1 = (nb_half - max_exact) / math.log(max_distance / max_exact)
    c0 = -math.log(max_exact) * c1
    safe = jnp.maximum(nabs, 1).astype(jnp.float32)   # log path only used when nabs >= max_exact
    frac = jnp.log(safe) * c1 + c0
    # frac >= 0 wherever the large path is selected, so int32 truncation
    # (toward zero) matches torch's .long() there.
    val_if_large = max_exact + frac.astype(jnp.int32)
    val_if_large = jnp.minimum(val_if_large, nb_half - 1)
    bucket = ret + jnp.where(is_small, nabs, val_if_large)     # (1, dpad) int32

    # ---- exact f32 embedding gather on the slab (tiny: 32 selects on 8xDPAD) ----
    wt = wt_ref[...]                                           # (heads, num_buckets)
    vals = jnp.zeros((heads, dpad), jnp.float32)
    for b in range(num_buckets):                               # static, tiny
        vals = vals + jnp.where(bucket == b, wt[:, b:b + 1], 0.0)

    # mask = -1e10 where |rel| > 20 else 0   (reuses nabs)
    mask = jnp.where(nabs > 20, jnp.float32(-1e10), jnp.float32(0.0))
    slab = vals + mask                                         # (heads, dpad) f32

    # ---- expand slab -> (TQ, TK) per head:  out[h, i, j] = slab[h, j - i + tq].
    # Strided lane roll: row i is rotated by (dpad - tq) + i, so
    #   out[i, j] = slab[(j - (dpad - tq) - i) mod dpad] = slab[j + tq - i]
    # (no wrap in the used region since 1 <= j + tq - i <= tq + tk - 1 < dpad).
    shift0 = dpad - tq
    for h in range(heads):                                     # heads is small (8)
        bcast = jnp.broadcast_to(slab[h:h + 1, :], (tq, dpad))
        rolled = pltpu.roll(bcast, shift0, 1, stride=1, stride_axis=0)
        out_ref[h] = rolled[:, :tk].astype(out_ref.dtype)


def relative_position_bias(emb_weight, n, *, num_buckets=32, max_distance=128,
                           tq=256, tk=512, out_dtype=jnp.bfloat16):
    """emb_weight: (num_buckets, heads), as stored by nn.Embedding(num_buckets, heads).

    Returns the (heads, n, n) bias.  tq must be a multiple of 8 (or >= n) and
    tk a multiple of 128 (or >= n).  out_dtype=jnp.float32 reproduces the
    PyTorch module exactly; the bfloat16 default halves HBM write traffic
    (the kernel is writeback-roofline bound).
    """
    nb, heads = emb_weight.shape
    assert nb == num_buckets
    tq = min(tq, n)
    tk = min(tk, n)
    grid = (pl.cdiv(n, tq), pl.cdiv(n, tk))
    dpad = ((tq + tk + 127) // 128) * 128     # slab lanes (>= tq+tk), lane-aligned

    # Table is tiny (num_buckets x heads): pre-transpose, keep f32 (exact).
    w_t = jnp.asarray(emb_weight, jnp.float32).T               # (heads, num_buckets)

    kernel = partial(_rel_pos_bias_kernel, num_buckets=num_buckets,
                     max_distance=max_distance, dpad=dpad)
    return pl.pallas_call(
        kernel,
        out_shape=jax.ShapeDtypeStruct((heads, n, n), out_dtype),
        grid=grid,
        in_specs=[pl.BlockSpec((heads, num_buckets), lambda i, j: (0, 0))],
        out_specs=pl.BlockSpec((heads, tq, tk), lambda i, j: (0, i, j)),
        compiler_params=pltpu.CompilerParams(
            dimension_semantics=("parallel", "parallel"),
            vmem_limit_bytes=48 * 1024 * 1024),
    )(w_t)


# ---------------- pure-JAX reference (for verification only) ----------------
def _reference(emb_weight, n, num_buckets=32, max_distance=128):
    q = jnp.arange(n)
    rel = q[None, :] - q[:, None]
    nrel = -rel
    nb_half = num_buckets // 2
    ret = jnp.where(nrel < 0, nb_half, 0)
    nabs = jnp.abs(nrel)
    max_exact = nb_half // 2
    is_small = nabs < max_exact
    safe = jnp.maximum(nabs, 1).astype(jnp.float32)
    frac = (jnp.log(safe / max_exact) / math.log(max_distance / max_exact)
            * (nb_half - max_exact))
    val_if_large = jnp.minimum(max_exact + frac.astype(jnp.int32), nb_half - 1)
    bucket = ret + jnp.where(is_small, nabs, val_if_large)
    mask = jnp.where(jnp.abs(rel) > 20, -1e10, 0.0).astype(jnp.float32)
    values = jnp.asarray(emb_weight, jnp.float32)[bucket]       # (n, n, heads)
    bias = mask[None] + jnp.transpose(values, (2, 0, 1))
    # Distances whose float bucketing lands exactly on an integer boundary: a
    # 1-ulp difference between log formulations can legally flip the bucket
    # there (the PyTorch result is itself implementation-defined at these points).
    boundary = (~is_small) & (jnp.abs(frac - jnp.round(frac)) < 1e-3)
    return bias, boundary


if __name__ == "__main__":
    heads, num_buckets, max_distance = 8, 32, 128
    key = jax.random.PRNGKey(0)
    # nn.Embedding(num_buckets, heads) default init ~ N(0, 1)
    emb_weight = jax.random.normal(key, (num_buckets, heads), dtype=jnp.float32)

    # float32 output: matches the PyTorch module (bucket-boundary ties exempted).
    for n, tq, tk in [(16, 256, 512), (256, 64, 128)]:
        out = relative_position_bias(emb_weight, n, num_buckets=num_buckets,
                                     max_distance=max_distance, tq=tq, tk=tk,
                                     out_dtype=jnp.float32)
        out = jax.block_until_ready(out)
        assert out.shape == (heads, n, n)
        ref, boundary = _reference(emb_weight, n, num_buckets, max_distance)
        o = jnp.where(boundary[None], 0.0, out)
        r = jnp.where(boundary[None], 0.0, ref)
        assert bool(jnp.allclose(o, r, atol=1e-5, rtol=1e-5)), f"f32 mismatch at n={n}"

    # default bfloat16 output with default (large) tiles — writeback-roofline path.
    n = 512
    out_bf = relative_position_bias(emb_weight, n, num_buckets=num_buckets,
                                    max_distance=max_distance)
    out_bf = jax.block_until_ready(out_bf)
    assert out_bf.dtype == jnp.bfloat16 and out_bf.shape == (heads, n, n)
    ref, boundary = _reference(emb_weight, n, num_buckets, max_distance)
    o = jnp.where(boundary[None], 0.0, out_bf.astype(jnp.float32))
    r = jnp.where(boundary[None], 0.0, ref)
    assert bool(jnp.allclose(o, r, rtol=1e-2, atol=1e-2)), "bf16 mismatch"

    print("KERNEL_OK")
</pallas_src>

<mosaic_0001>
module attributes {stable_mosaic.version = 11 : i64} {
  func.func @_rel_pos_bias_kernel(%arg0: i32, %arg1: i32, %arg2: memref<8x32xf32, #tpu.memory_space<vmem>>, %arg3: memref<8x16x16xf32, #tpu.memory_space<vmem>>) attributes {dimension_semantics = [#tpu.dimension_semantics<parallel>, #tpu.dimension_semantics<parallel>], iteration_bounds = array<i64: 1, 1>, scalar_prefetch = 0 : i64, scratch_operands = 0 : i64, tpu.core_type = #tpu.core_type<tc>, window_params = [{pipeline_mode = #tpu.pipeline_mode<synchronous>, transform_indices = @transform_0, window_bounds = array<i64: 8, 32>}, {transform_indices = @transform_1, window_bounds = array<i64: 8, 16, 16>}]} {
    %c16_i32 = arith.constant 16 : i32
    %0 = arith.muli %arg0, %c16_i32 : i32
    %c16_i32_0 = arith.constant 16 : i32
    %1 = arith.muli %arg1, %c16_i32_0 : i32
    %2 = tpu.iota {dimensions = array<i32: 1>} : vector<1x128xi32>
    %3 = arith.subi %1, %0 : i32
    %c16_i32_1 = arith.constant 16 : i32
    %4 = arith.subi %3, %c16_i32_1 : i32
    %5 = vector.broadcast %4 : i32 to vector<1x128xi32>
    %6 = arith.addi %2, %5 : vector<1x128xi32>
    %c0_i32 = arith.constant 0 : i32
    %7 = vector.broadcast %c0_i32 : i32 to vector<1x128xi32>
    %8 = arith.subi %7, %6 : vector<1x128xi32>
    %c0_i32_2 = arith.constant 0 : i32
    %9 = vector.broadcast %c0_i32_2 : i32 to vector<1x128xi32>
    %10 = arith.cmpi slt, %8, %9 : vector<1x128xi32>
    %c16_i32_3 = arith.constant 16 : i32
    %c0_i32_4 = arith.constant 0 : i32
    %11 = vector.broadcast %c16_i32_3 : i32 to vector<1x128xi32>
    %12 = vector.broadcast %c0_i32_4 : i32 to vector<1x128xi32>
    %13 = arith.select %10, %11, %12 : vector<1x128xi1>, vector<1x128xi32>
    %14 = math.absi %8 : vector<1x128xi32>
    %c8_i32 = arith.constant 8 : i32
    %15 = vector.broadcast %c8_i32 : i32 to vector<1x128xi32>
    %16 = arith.cmpi slt, %14, %15 : vector<1x128xi32>
    %c1_i32 = arith.constant 1 : i32
    %17 = vector.broadcast %c1_i32 : i32 to vector<1x128xi32>
    %18 = arith.maxsi %14, %17 : vector<1x128xi32>
    %19 = arith.sitofp %18 : vector<1x128xi32> to vector<1x128xf32>
    %20 = math.log %19 : vector<1x128xf32>
    %cst = arith.constant 2.885390e+00 : f32
    %21 = vector.broadcast %cst : f32 to vector<1x128xf32>
    %22 = arith.mulf %20, %21 : vector<1x128xf32>
    %cst_5 = arith.constant -6.000000e+00 : f32
    %23 = vector.broadcast %cst_5 : f32 to vector<1x128xf32>
    %24 = arith.addf %22, %23 : vector<1x128xf32>
    %25 = arith.fptosi %24 : vector<1x128xf32> to vector<1x128xi32>
    %c8_i32_6 = arith.constant 8 : i32
    %26 = vector.broadcast %c8_i32_6 : i32 to vector<1x128xi32>
    %27 = arith.addi %26, %25 : vector<1x128xi32>
    %c15_i32 = arith.constant 15 : i32
    %28 = vector.broadcast %c15_i32 : i32 to vector<1x128xi32>
    %29 = arith.minsi %27, %28 : vector<1x128xi32>
    %30 = arith.select %16, %14, %29 : vector<1x128xi1>, vector<1x128xi32>
    %31 = arith.addi %13, %30 : vector<1x128xi32>
    %c0 = arith.constant 0 : index
    %c0_7 = arith.constant 0 : index
    %32 = vector.load %arg2[%c0, %c0_7] : memref<8x32xf32, #tpu.memory_space<vmem>>, vector<8x32xf32>
    %cst_8 = arith.constant 0.000000e+00 : f32
    %33 = vector.broadcast %cst_8 : f32 to vector<8x128xf32>
    %c0_i32_9 = arith.constant 0 : i32
    %34 = vector.broadcast %c0_i32_9 : i32 to vector<1x128xi32>
    %35 = arith.cmpi eq, %31, %34 : vector<1x128xi32>
    %36 = vector.extract_strided_slice %32 {offsets = [0, 0], sizes = [8, 1], strides = [1, 1]} : vector<8x32xf32> to vector<8x1xf32>
    %cst_10 = arith.constant 0.000000e+00 : f32
    %37 = vector.shape_cast %35 : vector<1x128xi1> to vector<1x128xi1>
    %38 = vector.broadcast %37 : vector<1x128xi1> to vector<8x128xi1>
    %39 = vector.shape_cast %36 : vector<8x1xf32> to vector<8x1xf32>
    %40 = vector.broadcast %39 : vector<8x1xf32> to vector<8x128xf32>
    %41 = vector.broadcast %cst_10 : f32 to vector<8x128xf32>
    %42 = arith.select %38, %40, %41 : vector<8x128xi1>, vector<8x128xf32>
    %43 = arith.addf %33, %42 : vector<8x128xf32>
    %c1_i32_11 = arith.constant 1 : i32
    %44 = vector.broadcast %c1_i32_11 : i32 to vector<1x128xi32>
    %45 = arith.cmpi eq, %31, %44 : vector<1x128xi32>
    %46 = vector.extract_strided_slice %32 {offsets = [0, 1], sizes = [8, 1], strides = [1, 1]} : vector<8x32xf32> to vector<8x1xf32>
    %cst_12 = arith.constant 0.000000e+00 : f32
    %47 = vector.shape_cast %45 : vector<1x128xi1> to vector<1x128xi1>
    %48 = vector.broadcast %47 : vector<1x128xi1> to vector<8x128xi1>
    %49 = vector.shape_cast %46 : vector<8x1xf32> to vector<8x1xf32>
    %50 = vector.broadcast %49 : vector<8x1xf32> to vector<8x128xf32>
    %51 = vector.broadcast %cst_12 : f32 to vector<8x128xf32>
    %52 = arith.select %48, %50, %51 : vector<8x128xi1>, vector<8x128xf32>
    %53 = arith.addf %43, %52 : vector<8x128xf32>
    %c2_i32 = arith.constant 2 : i32
    %54 = vector.broadcast %c2_i32 : i32 to vector<1x128xi32>
    %55 = arith.cmpi eq, %31, %54 : vector<1x128xi32>
    %56 = vector.extract_strided_slice %32 {offsets = [0, 2], sizes = [8, 1], strides = [1, 1]} : vector<8x32xf32> to vector<8x1xf32>
    %cst_13 = arith.constant 0.000000e+00 : f32
    %57 = vector.shape_cast %55 : vector<1x128xi1> to vector<1x128xi1>
    %58 = vector.broadcast %57 : vector<1x128xi1> to vector<8x128xi1>
    %59 = vector.shape_cast %56 : vector<8x1xf32> to vector<8x1xf32>
    %60 = vector.broadcast %59 : vector<8x1xf32> to vector<8x128xf32>
    %61 = vector.broadcast %cst_13 : f32 to vector<8x128xf32>
    %62 = arith.select %58, %60, %61 : vector<8x128xi1>, vector<8x128xf32>
    %63 = arith.addf %53, %62 : vector<8x128xf32>
    %c3_i32 = arith.constant 3 : i32
    %64 = vector.broadcast %c3_i32 : i32 to vector<1x128xi32>
    %65 = arith.cmpi eq, %31, %64 : vector<1x128xi32>
    %66 = vector.extract_strided_slice %32 {offsets = [0, 3], sizes = [8, 1], strides = [1, 1]} : vector<8x32xf32> to vector<8x1xf32>
    %cst_14 = arith.constant 0.000000e+00 : f32
    %67 = vector.shape_cast %65 : vector<1x128xi1> to vector<1x128xi1>
    %68 = vector.broadcast %67 : vector<1x128xi1> to vector<8x128xi1>
    %69 = vector.shape_cast %66 : vector<8x1xf32> to vector<8x1xf32>
    %70 = vector.broadcast %69 : vector<8x1xf32> to vector<8x128xf32>
    %71 = vector.broadcast %cst_14 : f32 to vector<8x128xf32>
    %72 = arith.select %68, %70, %71 : vector<8x128xi1>, vector<8x128xf32>
    %73 = arith.addf %63, %72 : vector<8x128xf32>
    %c4_i32 = arith.constant 4 : i32
    %74 = vector.broadcast %c4_i32 : i32 to vector<1x128xi32>
    %75 = arith.cmpi eq, %31, %74 : vector<1x128xi32>
    %76 = vector.extract_strided_slice %32 {offsets = [0, 4], sizes = [8, 1], strides = [1, 1]} : vector<8x32xf32> to vector<8x1xf32>
    %cst_15 = arith.constant 0.000000e+00 : f32
    %77 = vector.shape_cast %75 : vector<1x128xi1> to vector<1x128xi1>
    %78 = vector.broadcast %77 : vector<1x128xi1> to vector<8x128xi1>
    %79 = vector.shape_cast %76 : vector<8x1xf32> to vector<8x1xf32>
    %80 = vector.broadcast %79 : vector<8x1xf32> to vector<8x128xf32>
    %81 = vector.broadcast %cst_15 : f32 to vector<8x128xf32>
    %82 = arith.select %78, %80, %81 : vector<8x128xi1>, vector<8x128xf32>
    %83 = arith.addf %73, %82 : vector<8x128xf32>
    %c5_i32 = arith.constant 5 : i32
    %84 = vector.broadcast %c5_i32 : i32 to vector<1x128xi32>
    %85 = arith.cmpi eq, %31, %84 : vector<1x128xi32>
    %86 = vector.extract_strided_slice %32 {offsets = [0, 5], sizes = [8, 1], strides = [1, 1]} : vector<8x32xf32> to vector<8x1xf32>
    %cst_16 = arith.constant 0.000000e+00 : f32
    %87 = vector.shape_cast %85 : vector<1x128xi1> to vector<1x128xi1>
    %88 = vector.broadcast %87 : vector<1x128xi1> to vector<8x128xi1>
    %89 = vector.shape_cast %86 : vector<8x1xf32> to vector<8x1xf32>
    %90 = vector.broadcast %89 : vector<8x1xf32> to vector<8x128xf32>
    %91 = vector.broadcast %cst_16 : f32 to vector<8x128xf32>
    %92 = arith.select %88, %90, %91 : vector<8x128xi1>, vector<8x128xf32>
    %93 = arith.addf %83, %92 : vector<8x128xf32>
    %c6_i32 = arith.constant 6 : i32
    %94 = vector.broadcast %c6_i32 : i32 to vector<1x128xi32>
    %95 = arith.cmpi eq, %31, %94 : vector<1x128xi32>
    %96 = vector.extract_strided_slice %32 {offsets = [0, 6], sizes = [8, 1], strides = [1, 1]} : vector<8x32xf32> to vector<8x1xf32>
    %cst_17 = arith.constant 0.000000e+00 : f32
    %97 = vector.shape_cast %95 : vector<1x128xi1> to vector<1x128xi1>
    %98 = vector.broadcast %97 : vector<1x128xi1> to vector<8x128xi1>
    %99 = vector.shape_cast %96 : vector<8x1xf32> to vector<8x1xf32>
    %100 = vector.broadcast %99 : vector<8x1xf32> to vector<8x128xf32>
    %101 = vector.broadcast %cst_17 : f32 to vector<8x128xf32>
    %102 = arith.select %98, %100, %101 : vector<8x128xi1>, vector<8x128xf32>
    %103 = arith.addf %93, %102 : vector<8x128xf32>
    %c7_i32 = arith.constant 7 : i32
    %104 = vector.broadcast %c7_i32 : i32 to vector<1x128xi32>
    %105 = arith.cmpi eq, %31, %104 : vector<1x128xi32>
    %106 = vector.extract_strided_slice %32 {offsets = [0, 7], sizes = [8, 1], strides = [1, 1]} : vector<8x32xf32> to vector<8x1xf32>
    %cst_18 = arith.constant 0.000000e+00 : f32
    %107 = vector.shape_cast %105 : vector<1x128xi1> to vector<1x128xi1>
    %108 = vector.broadcast %107 : vector<1x128xi1> to vector<8x128xi1>
    %109 = vector.shape_cast %106 : vector<8x1xf32> to vector<8x1xf32>
    %110 = vector.broadcast %109 : vector<8x1xf32> to vector<8x128xf32>
    %111 = vector.broadcast %cst_18 : f32 to vector<8x128xf32>
    %112 = arith.select %108, %110, %111 : vector<8x128xi1>, vector<8x128xf32>
    %113 = arith.addf %103, %112 : vector<8x128xf32>
    %c8_i32_19 = arith.constant 8 : i32
    %114 = vector.broadcast %c8_i32_19 : i32 to vector<1x128xi32>
    %115 = arith.cmpi eq, %31, %114 : vector<1x128xi32>
    %116 = vector.extract_strided_slice %32 {offsets = [0, 8], sizes = [8, 1], strides = [1, 1]} : vector<8x32xf32> to vector<8x1xf32>
    %cst_20 = arith.constant 0.000000e+00 : f32
    %117 = vector.shape_cast %115 : vector<1x128xi1> to vector<1x128xi1>
    %118 = vector.broadcast %117 : vector<1x128xi1> to vector<8x128xi1>
    %119 = vector.shape_cast %116 : vector<8x1xf32> to vector<8x1xf32>
    %120 = vector.broadcast %119 : vector<8x1xf32> to vector<8x128xf32>
    %121 = vector.broadcast %cst_20 : f32 to vector<8x128xf32>
    %122 = arith.select %118, %120, %121 : vector<8x128xi1>, vector<8x128xf32>
    %123 = arith.addf %113, %122 : vector<8x128xf32>
    %c9_i32 = arith.constant 9 : i32
    %124 = vector.broadcast %c9_i32 : i32 to vector<1x128xi32>
    %125 = arith.cmpi eq, %31, %124 : vector<1x128xi32>
    %126 = vector.extract_strided_slice %32 {offsets = [0, 9], sizes = [8, 1], strides = [1, 1]} : vector<8x32xf32> to vector<8x1xf32>
    %cst_21 = arith.constant 0.000000e+00 : f32
    %127 = vector.shape_cast %125 : vector<1x128xi1> to vector<1x128xi1>
    %128 = vector.broadcast %127 : vector<1x128xi1> to vector<8x128xi1>
    %129 = vector.shape_cast %126 : vector<8x1xf32> to vector<8x1xf32>
    %130 = vector.broadcast %129 : vector<8x1xf32> to vector<8x128xf32>
    %131 = vector.broadcast %cst_21 : f32 to vector<8x128xf32>
    %132 = arith.select %128, %130, %131 : vector<8x128xi1>, vector<8x128xf32>
    %133 = arith.addf %123, %132 : vector<8x128xf32>
    %c10_i32 = arith.constant 10 : i32
    %134 = vector.broadcast %c10_i32 : i32 to vector<1x128xi32>
    %135 = arith.cmpi eq, %31, %134 : vector<1x128xi32>
    %136 = vector.extract_strided_slice %32 {offsets = [0, 10], sizes = [8, 1], strides = [1, 1]} : vector<8x32xf32> to vector<8x1xf32>
    %cst_22 = arith.constant 0.000000e+00 : f32
    %137 = vector.shape_cast %135 : vector<1x128xi1> to vector<1x128xi1>
    %138 = vector.broadcast %137 : vector<1x128xi1> to vector<8x128xi1>
    %139 = vector.shape_cast %136 : vector<8x1xf32> to vector<8x1xf32>
    %140 = vector.broadcast %139 : vector<8x1xf32> to vector<8x128xf32>
    %141 = vector.broadcast %cst_22 : f32 to vector<8x128xf32>
    %142 = arith.select %138, %140, %141 : vector<8x128xi1>, vector<8x128xf32>
    %143 = arith.addf %133, %142 : vector<8x128xf32>
    %c11_i32 = arith.constant 11 : i32
    %144 = vector.broadcast %c11_i32 : i32 to vector<1x128xi32>
    %145 = arith.cmpi eq, %31, %144 : vector<1x128xi32>
    %146 = vector.extract_strided_slice %32 {offsets = [0, 11], sizes = [8, 1], strides = [1, 1]} : vector<8x32xf32> to vector<8x1xf32>
    %cst_23 = arith.constant 0.000000e+00 : f32
    %147 = vector.shape_cast %145 : vector<1x128xi1> to vector<1x128xi1>
    %148 = vector.broadcast %147 : vector<1x128xi1> to vector<8x128xi1>
    %149 = vector.shape_cast %146 : vector<8x1xf32> to vector<8x1xf32>
    %150 = vector.broadcast %149 : vector<8x1xf32> to vector<8x128xf32>
    %151 = vector.broadcast %cst_23 : f32 to vector<8x128xf32>
    %152 = arith.select %148, %150, %151 : vector<8x128xi1>, vector<8x128xf32>
    %153 = arith.addf %143, %152 : vector<8x128xf32>
    %c12_i32 = arith.constant 12 : i32
    %154 = vector.broadcast %c12_i32 : i32 to vector<1x128xi32>
    %155 = arith.cmpi eq, %31, %154 : vector<1x128xi32>
    %156 = vector.extract_strided_slice %32 {offsets = [0, 12], sizes = [8, 1], strides = [1, 1]} : vector<8x32xf32> to vector<8x1xf32>
    %cst_24 = arith.constant 0.000000e+00 : f32
    %157 = vector.shape_cast %155 : vector<1x128xi1> to vector<1x128xi1>
    %158 = vector.broadcast %157 : vector<1x128xi1> to vector<8x128xi1>
    %159 = vector.shape_cast %156 : vector<8x1xf32> to vector<8x1xf32>
    %160 = vector.broadcast %159 : vector<8x1xf32> to vector<8x128xf32>
    %161 = vector.broadcast %cst_24 : f32 to vector<8x128xf32>
    %162 = arith.select %158, %160, %161 : vector<8x128xi1>, vector<8x128xf32>
    %163 = arith.addf %153, %162 : vector<8x128xf32>
    %c13_i32 = arith.constant 13 : i32
    %164 = vector.broadcast %c13_i32 : i32 to vector<1x128xi32>
    %165 = arith.cmpi eq, %31, %164 : vector<1x128xi32>
    %166 = vector.extract_strided_slice %32 {offsets = [0, 13], sizes = [8, 1], strides = [1, 1]} : vector<8x32xf32> to vector<8x1xf32>
    %cst_25 = arith.constant 0.000000e+00 : f32
    %167 = vector.shape_cast %165 : vector<1x128xi1> to vector<1x128xi1>
    %168 = vector.broadcast %167 : vector<1x128xi1> to vector<8x128xi1>
    %169 = vector.shape_cast %166 : vector<8x1xf32> to vector<8x1xf32>
    %170 = vector.broadcast %169 : vector<8x1xf32> to vector<8x128xf32>
    %171 = vector.broadcast %cst_25 : f32 to vector<8x128xf32>
    %172 = arith.select %168, %170, %171 : vector<8x128xi1>, vector<8x128xf32>
    %173 = arith.addf %163, %172 : vector<8x128xf32>
    %c14_i32 = arith.constant 14 : i32
    %174 = vector.broadcast %c14_i32 : i32 to vector<1x128xi32>
    %175 = arith.cmpi eq, %31, %174 : vector<1x128xi32>
    %176 = vector.extract_strided_slice %32 {offsets = [0, 14], sizes = [8, 1], strides = [1, 1]} : vector<8x32xf32> to vector<8x1xf32>
    %cst_26 = arith.constant 0.000000e+00 : f32
    %177 = vector.shape_cast %175 : vector<1x128xi1> to vector<1x128xi1>
    %178 = vector.broadcast %177 : vector<1x128xi1> to vector<8x128xi1>
    %179 = vector.shape_cast %176 : vector<8x1xf32> to vector<8x1xf32>
    %180 = vector.broadcast %179 : vector<8x1xf32> to vector<8x128xf32>
    %181 = vector.broadcast %cst_26 : f32 to vector<8x128xf32>
    %182 = arith.select %178, %180, %181 : vector<8x128xi1>, vector<8x128xf32>
    %183 = arith.addf %173, %182 : vector<8x128xf32>
    %c15_i32_27 = arith.constant 15 : i32
    %184 = vector.broadcast %c15_i32_27 : i32 to vector<1x128xi32>
    %185 = arith.cmpi eq, %31, %184 : vector<1x128xi32>
    %186 = vector.extract_strided_slice %32 {offsets = [0, 15], sizes = [8, 1], strides = [1, 1]} : vector<8x32xf32> to vector<8x1xf32>
    %cst_28 = arith.constant 0.000000e+00 : f32
    %187 = vector.shape_cast %185 : vector<1x128xi1> to vector<1x128xi1>
    %188 = vector.broadcast %187 : vector<1x128xi1> to vector<8x128xi1>
    %189 = vector.shape_cast %186 : vector<8x1xf32> to vector<8x1xf32>
    %190 = vector.broadcast %189 : vector<8x1xf32> to vector<8x128xf32>
    %191 = vector.broadcast %cst_28 : f32 to vector<8x128xf32>
    %192 = arith.select %188, %190, %191 : vector<8x128xi1>, vector<8x128xf32>
    %193 = arith.addf %183, %192 : vector<8x128xf32>
    %c16_i32_29 = arith.constant 16 : i32
    %194 = vector.broadcast %c16_i32_29 : i32 to vector<1x128xi32>
    %195 = arith.cmpi eq, %31, %194 : vector<1x128xi32>
    %196 = vector.extract_strided_slice %32 {offsets = [0, 16], sizes = [8, 1], strides = [1, 1]} : vector<8x32xf32> to vector<8x1xf32>
    %cst_30 = arith.constant 0.000000e+00 : f32
    %197 = vector.shape_cast %195 : vector<1x128xi1> to vector<1x128xi1>
    %198 = vector.broadcast %197 : vector<1x128xi1> to vector<8x128xi1>
    %199 = vector.shape_cast %196 : vector<8x1xf32> to vector<8x1xf32>
    %200 = vector.broadcast %199 : vector<8x1xf32> to vector<8x128xf32>
    %201 = vector.broadcast %cst_30 : f32 to vector<8x128xf32>
    %202 = arith.select %198, %200, %201 : vector<8x128xi1>, vector<8x128xf32>
    %203 = arith.addf %193, %202 : vector<8x128xf32>
    %c17_i32 = arith.constant 17 : i32
    %204 = vector.broadcast %c17_i32 : i32 to vector<1x128xi32>
    %205 = arith.cmpi eq, %31, %204 : vector<1x128xi32>
    %206 = vector.extract_strided_slice %32 {offsets = [0, 17], sizes = [8, 1], strides = [1, 1]} : vector<8x32xf32> to vector<8x1xf32>
    %cst_31 = arith.constant 0.000000e+00 : f32
    %207 = vector.shape_cast %205 : vector<1x128xi1> to vector<1x128xi1>
    %208 = vector.broadcast %207 : vector<1x128xi1> to vector<8x128xi1>
    %209 = vector.shape_cast %206 : vector<8x1xf32> to vector<8x1xf32>
    %210 = vector.broadcast %209 : vector<8x1xf32> to vector<8x128xf32>
    %211 = vector.broadcast %cst_31 : f32 to vector<8x128xf32>
    %212 = arith.select %208, %210, %211 : vector<8x128xi1>, vector<8x128xf32>
    %213 = arith.addf %203, %212 : vector<8x128xf32>
    %c18_i32 = arith.constant 18 : i32
    %214 = vector.broadcast %c18_i32 : i32 to vector<1x128xi32>
    %215 = arith.cmpi eq, %31, %214 : vector<1x128xi32>
    %216 = vector.extract_strided_slice %32 {offsets = [0, 18], sizes = [8, 1], strides = [1, 1]} : vector<8x32xf32> to vector<8x1xf32>
    %cst_32 = arith.constant 0.000000e+00 : f32
    %217 = vector.shape_cast %215 : vector<1x128xi1> to vector<1x128xi1>
    %218 = vector.broadcast %217 : vector<1x128xi1> to vector<8x128xi1>
    %219 = vector.shape_cast %216 : vector<8x1xf32> to vector<8x1xf32>
    %220 = vector.broadcast %219 : vector<8x1xf32> to vector<8x128xf32>
    %221 = vector.broadcast %cst_32 : f32 to vector<8x128xf32>
    %222 = arith.select %218, %220, %221 : vector<8x128xi1>, vector<8x128xf32>
    %223 = arith.addf %213, %222 : vector<8x128xf32>
    %c19_i32 = arith.constant 19 : i32
    %224 = vector.broadcast %c19_i32 : i32 to vector<1x128xi32>
    %225 = arith.cmpi eq, %31, %224 : vector<1x128xi32>
    %226 = vector.extract_strided_slice %32 {offsets = [0, 19], sizes = [8, 1], strides = [1, 1]} : vector<8x32xf32> to vector<8x1xf32>
    %cst_33 = arith.constant 0.000000e+00 : f32
    %227 = vector.shape_cast %225 : vector<1x128xi1> to vector<1x128xi1>
    %228 = vector.broadcast %227 : vector<1x128xi1> to vector<8x128xi1>
    %229 = vector.shape_cast %226 : vector<8x1xf32> to vector<8x1xf32>
    %230 = vector.broadcast %229 : vector<8x1xf32> to vector<8x128xf32>
    %231 = vector.broadcast %cst_33 : f32 to vector<8x128xf32>
    %232 = arith.select %228, %230, %231 : vector<8x128xi1>, vector<8x128xf32>
    %233 = arith.addf %223, %232 : vector<8x128xf32>
    %c20_i32 = arith.constant 20 : i32
    %234 = vector.broadcast %c20_i32 : i32 to vector<1x128xi32>
    %235 = arith.cmpi eq, %31, %234 : vector<1x128xi32>
    %236 = vector.extract_strided_slice %32 {offsets = [0, 20], sizes = [8, 1], strides = [1, 1]} : vector<8x32xf32> to vector<8x1xf32>
    %cst_34 = arith.constant 0.000000e+00 : f32
    %237 = vector.shape_cast %235 : vector<1x128xi1> to vector<1x128xi1>
    %238 = vector.broadcast %237 : vector<1x128xi1> to vector<8x128xi1>
    %239 = vector.shape_cast %236 : vector<8x1xf32> to vector<8x1xf32>
    %240 = vector.broadcast %239 : vector<8x1xf32> to vector<8x128xf32>
    %241 = vector.broadcast %cst_34 : f32 to vector<8x128xf32>
    %242 = arith.select %238, %240, %241 : vector<8x128xi1>, vector<8x128xf32>
    %243 = arith.addf %233, %242 : vector<8x128xf32>
    %c21_i32 = arith.constant 21 : i32
    %244 = vector.broadcast %c21_i32 : i32 to vector<1x128xi32>
    %245 = arith.cmpi eq, %31, %244 : vector<1x128xi32>
    %246 = vector.extract_strided_slice %32 {offsets = [0, 21], sizes = [8, 1], strides = [1, 1]} : vector<8x32xf32> to vector<8x1xf32>
    %cst_35 = arith.constant 0.000000e+00 : f32
    %247 = vector.shape_cast %245 : vector<1x128xi1> to vector<1x128xi1>
    %248 = vector.broadcast %247 : vector<1x128xi1> to vector<8x128xi1>
    %249 = vector.shape_cast %246 : vector<8x1xf32> to vector<8x1xf32>
    %250 = vector.broadcast %249 : vector<8x1xf32> to vector<8x128xf32>
    %251 = vector.broadcast %cst_35 : f32 to vector<8x128xf32>
    %252 = arith.select %248, %250, %251 : vector<8x128xi1>, vector<8x128xf32>
    %253 = arith.addf %243, %252 : vector<8x128xf32>
    %c22_i32 = arith.constant 22 : i32
    %254 = vector.broadcast %c22_i32 : i32 to vector<1x128xi32>
    %255 = arith.cmpi eq, %31, %254 : vector<1x128xi32>
    %256 = vector.extract_strided_slice %32 {offsets = [0, 22], sizes = [8, 1], strides = [1, 1]} : vector<8x32xf32> to vector<8x1xf32>
    %cst_36 = arith.constant 0.000000e+00 : f32
    %257 = vector.shape_cast %255 : vector<1x128xi1> to vector<1x128xi1>
    %258 = vector.broadcast %257 : vector<1x128xi1> to vector<8x128xi1>
    %259 = vector.shape_cast %256 : vector<8x1xf32> to vector<8x1xf32>
    %260 = vector.broadcast %259 : vector<8x1xf32> to vector<8x128xf32>
    %261 = vector.broadcast %cst_36 : f32 to vector<8x128xf32>
    %262 = arith.select %258, %260, %261 : vector<8x128xi1>, vector<8x128xf32>
    %263 = arith.addf %253, %262 : vector<8x128xf32>
    %c23_i32 = arith.constant 23 : i32
    %264 = vector.broadcast %c23_i32 : i32 to vector<1x128xi32>
    %265 = arith.cmpi eq, %31, %264 : vector<1x128xi32>
    %266 = vector.extract_strided_slice %32 {offsets = [0, 23], sizes = [8, 1], strides = [1, 1]} : vector<8x32xf32> to vector<8x1xf32>
    %cst_37 = arith.constant 0.000000e+00 : f32
    %267 = vector.shape_cast %265 : vector<1x128xi1> to vector<1x128xi1>
    %268 = vector.broadcast %267 : vector<1x128xi1> to vector<8x128xi1>
    %269 = vector.shape_cast %266 : vector<8x1xf32> to vector<8x1xf32>
    %270 = vector.broadcast %269 : vector<8x1xf32> to vector<8x128xf32>
    %271 = vector.broadcast %cst_37 : f32 to vector<8x128xf32>
    %272 = arith.select %268, %270, %271 : vector<8x128xi1>, vector<8x128xf32>
    %273 = arith.addf %263, %272 : vector<8x128xf32>
    %c24_i32 = arith.constant 24 : i32
    %274 = vector.broadcast %c24_i32 : i32 to vector<1x128xi32>
    %275 = arith.cmpi eq, %31, %274 : vector<1x128xi32>
    %276 = vector.extract_strided_slice %32 {offsets = [0, 24], sizes = [8, 1], strides = [1, 1]} : vector<8x32xf32> to vector<8x1xf32>
    %cst_38 = arith.constant 0.000000e+00 : f32
    %277 = vector.shape_cast %275 : vector<1x128xi1> to vector<1x128xi1>
    %278 = vector.broadcast %277 : vector<1x128xi1> to vector<8x128xi1>
    %279 = vector.shape_cast %276 : vector<8x1xf32> to vector<8x1xf32>
    %280 = vector.broadcast %279 : vector<8x1xf32> to vector<8x128xf32>
    %281 = vector.broadcast %cst_38 : f32 to vector<8x128xf32>
    %282 = arith.select %278, %280, %281 : vector<8x128xi1>, vector<8x128xf32>
    %283 = arith.addf %273, %282 : vector<8x128xf32>
    %c25_i32 = arith.constant 25 : i32
    %284 = vector.broadcast %c25_i32 : i32 to vector<1x128xi32>
    %285 = arith.cmpi eq, %31, %284 : vector<1x128xi32>
    %286 = vector.extract_strided_slice %32 {offsets = [0, 25], sizes = [8, 1], strides = [1, 1]} : vector<8x32xf32> to vector<8x1xf32>
    %cst_39 = arith.constant 0.000000e+00 : f32
    %287 = vector.shape_cast %285 : vector<1x128xi1> to vector<1x128xi1>
    %288 = vector.broadcast %287 : vector<1x128xi1> to vector<8x128xi1>
    %289 = vector.shape_cast %286 : vector<8x1xf32> to vector<8x1xf32>
    %290 = vector.broadcast %289 : vector<8x1xf32> to vector<8x128xf32>
    %291 = vector.broadcast %cst_39 : f32 to vector<8x128xf32>
    %292 = arith.select %288, %290, %291 : vector<8x128xi1>, vector<8x128xf32>
    %293 = arith.addf %283, %292 : vector<8x128xf32>
    %c26_i32 = arith.constant 26 : i32
    %294 = vector.broadcast %c26_i32 : i32 to vector<1x128xi32>
    %295 = arith.cmpi eq, %31, %294 : vector<1x128xi32>
    %296 = vector.extract_strided_slice %32 {offsets = [0, 26], sizes = [8, 1], strides = [1, 1]} : vector<8x32xf32> to vector<8x1xf32>
    %cst_40 = arith.constant 0.000000e+00 : f32
    %297 = vector.shape_cast %295 : vector<1x128xi1> to vector<1x128xi1>
    %298 = vector.broadcast %297 : vector<1x128xi1> to vector<8x128xi1>
    %299 = vector.shape_cast %296 : vector<8x1xf32> to vector<8x1xf32>
    %300 = vector.broadcast %299 : vector<8x1xf32> to vector<8x128xf32>
    %301 = vector.broadcast %cst_40 : f32 to vector<8x128xf32>
    %302 = arith.select %298, %300, %301 : vector<8x128xi1>, vector<8x128xf32>
    %303 = arith.addf %293, %302 : vector<8x128xf32>
    %c27_i32 = arith.constant 27 : i32
    %304 = vector.broadcast %c27_i32 : i32 to vector<1x128xi32>
    %305 = arith.cmpi eq, %31, %304 : vector<1x128xi32>
    %306 = vector.extract_strided_slice %32 {offsets = [0, 27], sizes = [8, 1], strides = [1, 1]} : vector<8x32xf32> to vector<8x1xf32>
    %cst_41 = arith.constant 0.000000e+00 : f32
    %307 = vector.shape_cast %305 : vector<1x128xi1> to vector<1x128xi1>
    %308 = vector.broadcast %307 : vector<1x128xi1> to vector<8x128xi1>
    %309 = vector.shape_cast %306 : vector<8x1xf32> to vector<8x1xf32>
    %310 = vector.broadcast %309 : vector<8x1xf32> to vector<8x128xf32>
    %311 = vector.broadcast %cst_41 : f32 to vector<8x128xf32>
    %312 = arith.select %308, %310, %311 : vector<8x128xi1>, vector<8x128xf32>
    %313 = arith.addf %303, %312 : vector<8x128xf32>
    %c28_i32 = arith.constant 28 : i32
    %314 = vector.broadcast %c28_i32 : i32 to vector<1x128xi32>
    %315 = arith.cmpi eq, %31, %314 : vector<1x128xi32>
    %316 = vector.extract_strided_slice %32 {offsets = [0, 28], sizes = [8, 1], strides = [1, 1]} : vector<8x32xf32> to vector<8x1xf32>
    %cst_42 = arith.constant 0.000000e+00 : f32
    %317 = vector.shape_cast %315 : vector<1x128xi1> to vector<1x128xi1>
    %318 = vector.broadcast %317 : vector<1x128xi1> to vector<8x128xi1>
    %319 = vector.shape_cast %316 : vector<8x1xf32> to vector<8x1xf32>
    %320 = vector.broadcast %319 : vector<8x1xf32> to vector<8x128xf32>
    %321 = vector.broadcast %cst_42 : f32 to vector<8x128xf32>
    %322 = arith.select %318, %320, %321 : vector<8x128xi1>, vector<8x128xf32>
    %323 = arith.addf %313, %322 : vector<8x128xf32>
    %c29_i32 = arith.constant 29 : i32
    %324 = vector.broadcast %c29_i32 : i32 to vector<1x128xi32>
    %325 = arith.cmpi eq, %31, %324 : vector<1x128xi32>
    %326 = vector.extract_strided_slice %32 {offsets = [0, 29], sizes = [8, 1], strides = [1, 1]} : vector<8x32xf32> to vector<8x1xf32>
    %cst_43 = arith.constant 0.000000e+00 : f32
    %327 = vector.shape_cast %325 : vector<1x128xi1> to vector<1x128xi1>
    %328 = vector.broadcast %327 : vector<1x128xi1> to vector<8x128xi1>
    %329 = vector.shape_cast %326 : vector<8x1xf32> to vector<8x1xf32>
    %330 = vector.broadcast %329 : vector<8x1xf32> to vector<8x128xf32>
    %331 = vector.broadcast %cst_43 : f32 to vector<8x128xf32>
    %332 = arith.select %328, %330, %331 : vector<8x128xi1>, vector<8x128xf32>
    %333 = arith.addf %323, %332 : vector<8x128xf32>
    %c30_i32 = arith.constant 30 : i32
    %334 = vector.broadcast %c30_i32 : i32 to vector<1x128xi32>
    %335 = arith.cmpi eq, %31, %334 : vector<1x128xi32>
    %336 = vector.extract_strided_slice %32 {offsets = [0, 30], sizes = [8, 1], strides = [1, 1]} : vector<8x32xf32> to vector<8x1xf32>
    %cst_44 = arith.constant 0.000000e+00 : f32
    %337 = vector.shape_cast %335 : vector<1x128xi1> to vector<1x128xi1>
    %338 = vector.broadcast %337 : vector<1x128xi1> to vector<8x128xi1>
    %339 = vector.shape_cast %336 : vector<8x1xf32> to vector<8x1xf32>
    %340 = vector.broadcast %339 : vector<8x1xf32> to vector<8x128xf32>
    %341 = vector.broadcast %cst_44 : f32 to vector<8x128xf32>
    %342 = arith.select %338, %340, %341 : vector<8x128xi1>, vector<8x128xf32>
    %343 = arith.addf %333, %342 : vector<8x128xf32>
    %c31_i32 = arith.constant 31 : i32
    %344 = vector.broadcast %c31_i32 : i32 to vector<1x128xi32>
    %345 = arith.cmpi eq, %31, %344 : vector<1x128xi32>
    %346 = vector.extract_strided_slice %32 {offsets = [0, 31], sizes = [8, 1], strides = [1, 1]} : vector<8x32xf32> to vector<8x1xf32>
    %cst_45 = arith.constant 0.000000e+00 : f32
    %347 = vector.shape_cast %345 : vector<1x128xi1> to vector<1x128xi1>
    %348 = vector.broadcast %347 : vector<1x128xi1> to vector<8x128xi1>
    %349 = vector.shape_cast %346 : vector<8x1xf32> to vector<8x1xf32>
    %350 = vector.broadcast %349 : vector<8x1xf32> to vector<8x128xf32>
    %351 = vector.broadcast %cst_45 : f32 to vector<8x128xf32>
    %352 = arith.select %348, %350, %351 : vector<8x128xi1>, vector<8x128xf32>
    %353 = arith.addf %343, %352 : vector<8x128xf32>
    %c20_i32_46 = arith.constant 20 : i32
    %354 = vector.broadcast %c20_i32_46 : i32 to vector<1x128xi32>
    %355 = arith.cmpi sgt, %14, %354 : vector<1x128xi32>
    %cst_47 = arith.constant -1.000000e+10 : f32
    %cst_48 = arith.constant 0.000000e+00 : f32
    %356 = vector.broadcast %cst_47 : f32 to vector<1x128xf32>
    %357 = vector.broadcast %cst_48 : f32 to vector<1x128xf32>
    %358 = arith.select %355, %356, %357 : vector<1x128xi1>, vector<1x128xf32>
    %359 = vector.broadcast %358 : vector<1x128xf32> to vector<8x128xf32>
    %360 = arith.addf %353, %359 : vector<8x128xf32>
    %361 = vector.extract_strided_slice %360 {offsets = [0, 0], sizes = [1, 128], strides = [1, 1]} : vector<8x128xf32> to vector<1x128xf32>
    %362 = vector.shape_cast %361 : vector<1x128xf32> to vector<1x128xf32>
    %363 = vector.broadcast %362 : vector<1x128xf32> to vector<16x128xf32>
    %c112_i32 = arith.constant 112 : i32
    %364 = tpu.dynamic_rotate %363 by %c112_i32 dim 1 {stride = 1 : si32, stride_dimension = 0 : si32} : vector<16x128xf32>, i32 -> vector<16x128xf32>
    %365 = vector.extract_strided_slice %364 {offsets = [0, 0], sizes = [16, 16], strides = [1, 1]} : vector<16x128xf32> to vector<16x16xf32>
    %c0_49 = arith.constant 0 : index
    %c0_50 = arith.constant 0 : index
    %c0_51 = arith.constant 0 : index
    %366 = vector.load %arg3[%c0_49, %c0_50, %c0_51] : memref<8x16x16xf32, #tpu.memory_space<vmem>>, vector<1x16x16xf32>
    %367 = vector.shape_cast %366 : vector<1x16x16xf32> to vector<16x16xf32>
    %368 = vector.shape_cast %365 : vector<16x16xf32> to vector<1x16x16xf32>
    tpu.vector_store %arg3[%c0_49, %c0_50, %c0_51], %368 {strides = array<i32>} : memref<8x16x16xf32, #tpu.memory_space<vmem>>, vector<1x16x16xf32>,
    %369 = vector.extract_strided_slice %360 {offsets = [1, 0], sizes = [1, 128], strides = [1, 1]} : vector<8x128xf32> to vector<1x128xf32>
    %370 = vector.shape_cast %369 : vector<1x128xf32> to vector<1x128xf32>
    %371 = vector.broadcast %370 : vector<1x128xf32> to vector<16x128xf32>
    %c112_i32_52 = arith.constant 112 : i32
    %372 = tpu.dynamic_rotate %371 by %c112_i32_52 dim 1 {stride = 1 : si32, stride_dimension = 0 : si32} : vector<16x128xf32>, i32 -> vector<16x128xf32>
    %373 = vector.extract_strided_slice %372 {offsets = [0, 0], sizes = [16, 16], strides = [1, 1]} : vector<16x128xf32> to vector<16x16xf32>
    %c1 = arith.constant 1 : index
    %c0_53 = arith.constant 0 : index
    %c0_54 = arith.constant 0 : index
    %374 = vector.load %arg3[%c1, %c0_53, %c0_54] : memref<8x16x16xf32, #tpu.memory_space<vmem>>, vector<1x16x16xf32>
    %375 = vector.shape_cast %374 : vector<1x16x16xf32> to vector<16x16xf32>
    %376 = vector.shape_cast %373 : vector<16x16xf32> to vector<1x16x16xf32>
    tpu.vector_store %arg3[%c1, %c0_53, %c0_54], %376 {strides = array<i32>} : memref<8x16x16xf32, #tpu.memory_space<vmem>>, vector<1x16x16xf32>,
    %377 = vector.extract_strided_slice %360 {offsets = [2, 0], sizes = [1, 128], strides = [1, 1]} : vector<8x128xf32> to vector<1x128xf32>
    %378 = vector.shape_cast %377 : vector<1x128xf32> to vector<1x128xf32>
    %379 = vector.broadcast %378 : vector<1x128xf32> to vector<16x128xf32>
    %c112_i32_55 = arith.constant 112 : i32
    %380 = tpu.dynamic_rotate %379 by %c112_i32_55 dim 1 {stride = 1 : si32, stride_dimension = 0 : si32} : vector<16x128xf32>, i32 -> vector<16x128xf32>
    %381 = vector.extract_strided_slice %380 {offsets = [0, 0], sizes = [16, 16], strides = [1, 1]} : vector<16x128xf32> to vector<16x16xf32>
    %c2 = arith.constant 2 : index
    %c0_56 = arith.constant 0 : index
    %c0_57 = arith.constant 0 : index
    %382 = vector.load %arg3[%c2, %c0_56, %c0_57] : memref<8x16x16xf32, #tpu.memory_space<vmem>>, vector<1x16x16xf32>
    %383 = vector.shape_cast %382 : vector<1x16x16xf32> to vector<16x16xf32>
    %384 = vector.shape_cast %381 : vector<16x16xf32> to vector<1x16x16xf32>
    tpu.vector_store %arg3[%c2, %c0_56, %c0_57], %384 {strides = array<i32>} : memref<8x16x16xf32, #tpu.memory_space<vmem>>, vector<1x16x16xf32>,
    %385 = vector.extract_strided_slice %360 {offsets = [3, 0], sizes = [1, 128], strides = [1, 1]} : vector<8x128xf32> to vector<1x128xf32>
    %386 = vector.shape_cast %385 : vector<1x128xf32> to vector<1x128xf32>
    %387 = vector.broadcast %386 : vector<1x128xf32> to vector<16x128xf32>
    %c112_i32_58 = arith.constant 112 : i32
    %388 = tpu.dynamic_rotate %387 by %c112_i32_58 dim 1 {stride = 1 : si32, stride_dimension = 0 : si32} : vector<16x128xf32>, i32 -> vector<16x128xf32>
    %389 = vector.extract_strided_slice %388 {offsets = [0, 0], sizes = [16, 16], strides = [1, 1]} : vector<16x128xf32> to vector<16x16xf32>
    %c3 = arith.constant 3 : index
    %c0_59 = arith.constant 0 : index
    %c0_60 = arith.constant 0 : index
    %390 = vector.load %arg3[%c3, %c0_59, %c0_60] : memref<8x16x16xf32, #tpu.memory_space<vmem>>, vector<1x16x16xf32>
    %391 = vector.shape_cast %390 : vector<1x16x16xf32> to vector<16x16xf32>
    %392 = vector.shape_cast %389 : vector<16x16xf32> to vector<1x16x16xf32>
    tpu.vector_store %arg3[%c3, %c0_59, %c0_60], %392 {strides = array<i32>} : memref<8x16x16xf32, #tpu.memory_space<vmem>>, vector<1x16x16xf32>,
    %393 = vector.extract_strided_slice %360 {offsets = [4, 0], sizes = [1, 128], strides = [1, 1]} : vector<8x128xf32> to vector<1x128xf32>
    %394 = vector.shape_cast %393 : vector<1x128xf32> to vector<1x128xf32>
    %395 = vector.broadcast %394 : vector<1x128xf32> to vector<16x128xf32>
    %c112_i32_61 = arith.constant 112 : i32
    %396 = tpu.dynamic_rotate %395 by %c112_i32_61 dim 1 {stride = 1 : si32, stride_dimension = 0 : si32} : vector<16x128xf32>, i32 -> vector<16x128xf32>
    %397 = vector.extract_strided_slice %396 {offsets = [0, 0], sizes = [16, 16], strides = [1, 1]} : vector<16x128xf32> to vector<16x16xf32>
    %c4 = arith.constant 4 : index
    %c0_62 = arith.constant 0 : index
    %c0_63 = arith.constant 0 : index
    %398 = vector.load %arg3[%c4, %c0_62, %c0_63] : memref<8x16x16xf32, #tpu.memory_space<vmem>>, vector<1x16x16xf32>
    %399 = vector.shape_cast %398 : vector<1x16x16xf32> to vector<16x16xf32>
    %400 = vector.shape_cast %397 : vector<16x16xf32> to vector<1x16x16xf32>
    tpu.vector_store %arg3[%c4, %c0_62, %c0_63], %400 {strides = array<i32>} : memref<8x16x16xf32, #tpu.memory_space<vmem>>, vector<1x16x16xf32>,
    %401 = vector.extract_strided_slice %360 {offsets = [5, 0], sizes = [1, 128], strides = [1, 1]} : vector<8x128xf32> to vector<1x128xf32>
    %402 = vector.shape_cast %401 : vector<1x128xf32> to vector<1x128xf32>
    %403 = vector.broadcast %402 : vector<1x128xf32> to vector<16x128xf32>
    %c112_i32_64 = arith.constant 112 : i32
    %404 = tpu.dynamic_rotate %403 by %c112_i32_64 dim 1 {stride = 1 : si32, stride_dimension = 0 : si32} : vector<16x128xf32>, i32 -> vector<16x128xf32>
    %405 = vector.extract_strided_slice %404 {offsets = [0, 0], sizes = [16, 16], strides = [1, 1]} : vector<16x128xf32> to vector<16x16xf32>
    %c5 = arith.constant 5 : index
    %c0_65 = arith.constant 0 : index
    %c0_66 = arith.constant 0 : index
    %406 = vector.load %arg3[%c5, %c0_65, %c0_66] : memref<8x16x16xf32, #tpu.memory_space<vmem>>, vector<1x16x16xf32>
    %407 = vector.shape_cast %406 : vector<1x16x16xf32> to vector<16x16xf32>
    %408 = vector.shape_cast %405 : vector<16x16xf32> to vector<1x16x16xf32>
    tpu.vector_store %arg3[%c5, %c0_65, %c0_66], %408 {strides = array<i32>} : memref<8x16x16xf32, #tpu.memory_space<vmem>>, vector<1x16x16xf32>,
    %409 = vector.extract_strided_slice %360 {offsets = [6, 0], sizes = [1, 128], strides = [1, 1]} : vector<8x128xf32> to vector<1x128xf32>
    %410 = vector.shape_cast %409 : vector<1x128xf32> to vector<1x128xf32>
    %411 = vector.broadcast %410 : vector<1x128xf32> to vector<16x128xf32>
    %c112_i32_67 = arith.constant 112 : i32
    %412 = tpu.dynamic_rotate %411 by %c112_i32_67 dim 1 {stride = 1 : si32, stride_dimension = 0 : si32} : vector<16x128xf32>, i32 -> vector<16x128xf32>
    %413 = vector.extract_strided_slice %412 {offsets = [0, 0], sizes = [16, 16], strides = [1, 1]} : vector<16x128xf32> to vector<16x16xf32>
    %c6 = arith.constant 6 : index
    %c0_68 = arith.constant 0 : index
    %c0_69 = arith.constant 0 : index
    %414 = vector.load %arg3[%c6, %c0_68, %c0_69] : memref<8x16x16xf32, #tpu.memory_space<vmem>>, vector<1x16x16xf32>
    %415 = vector.shape_cast %414 : vector<1x16x16xf32> to vector<16x16xf32>
    %416 = vector.shape_cast %413 : vector<16x16xf32> to vector<1x16x16xf32>
    tpu.vector_store %arg3[%c6, %c0_68, %c0_69], %416 {strides = array<i32>} : memref<8x16x16xf32, #tpu.memory_space<vmem>>, vector<1x16x16xf32>,
    %417 = vector.extract_strided_slice %360 {offsets = [7, 0], sizes = [1, 128], strides = [1, 1]} : vector<8x128xf32> to vector<1x128xf32>
    %418 = vector.shape_cast %417 : vector<1x128xf32> to vector<1x128xf32>
    %419 = vector.broadcast %418 : vector<1x128xf32> to vector<16x128xf32>
    %c112_i32_70 = arith.constant 112 : i32
    %420 = tpu.dynamic_rotate %419 by %c112_i32_70 dim 1 {stride = 1 : si32, stride_dimension = 0 : si32} : vector<16x128xf32>, i32 -> vector<16x128xf32>
    %421 = vector.extract_strided_slice %420 {offsets = [0, 0], sizes = [16, 16], strides = [1, 1]} : vector<16x128xf32> to vector<16x16xf32>
    %c7 = arith.constant 7 : index
    %c0_71 = arith.constant 0 : index
    %c0_72 = arith.constant 0 : index
    %422 = vector.load %arg3[%c7, %c0_71, %c0_72] : memref<8x16x16xf32, #tpu.memory_space<vmem>>, vector<1x16x16xf32>
    %423 = vector.shape_cast %422 : vector<1x16x16xf32> to vector<16x16xf32>
    %424 = vector.shape_cast %421 : vector<16x16xf32> to vector<1x16x16xf32>
    tpu.vector_store %arg3[%c7, %c0_71, %c0_72], %424 {strides = array<i32>} : memref<8x16x16xf32, #tpu.memory_space<vmem>>, vector<1x16x16xf32>,
    return
  }
  func.func @transform_0(%arg0: i32, %arg1: i32) -> (i32, i32) {
    %c0_i32 = arith.constant 0 : i32
    %c0_i32_0 = arith.constant 0 : i32
    %c0_i32_1 = arith.constant 0 : i32
    return %c0_i32, %c0_i32_0 : i32, i32
  }
  func.func @transform_1(%arg0: i32, %arg1: i32) -> (i32, i32, i32) {
    %c0_i32 = arith.constant 0 : i32
    %c0_i32_0 = arith.constant 0 : i32
    return %c0_i32, %arg0, %arg1 : i32, i32, i32
  }
}

</mosaic_0001>

<bundles_post_ra>
// kernel: tpu_custom_call.1
= control target key start
LH: loop header
LB: loop body
LE: loop exit
PB: predicated region body
PF: predicated region fallthrough
CT: control target
= control target key end

     0   :  { %6 = vsyncpa [#allocation3], 0  ;;  %s771_s0 = inlined_call_operand.hbm [shape: f32[8,32], index: 0, kind: input, shape index: {}]   ;;  %s772_s1 = inlined_call_operand.hbm [shape: f32[8,16,16], index: 1, kind: output, shape index: {}]  }
   0x1   :  { %7 = vsyncpa [#allocation4], 0  ;;  %s603_s6 = smov [#allocation2]   ;;  %s555_s10 = scalar_lea.hbm %s771_s0, 128 }
   0x2   :  { %s14_s7 = sshll.u32 %s603_s6, 4  ;;  %p556_p0 = scmp.ne.s32.totalorder %s771_s0, %s555_s10  ;;  %s15_s7 = int_to_ptr.vmem [resolvable:$true] %s14_s7 }
   0x3   :  { %p559_p1 = scmp.lt.u32.totalorder %s555_s10, %s771_s0 }
   0x5   :  { %p561_p2 = pnand %p559_p1, %p556_p0 }
   0x7   :  { %564 = shalt.err (!%p561_p2)
}
   0x8   :  { %s565_s15 = scalar_lea.vmem %s15_s7, 128  ;;  %p570_p4 = scmp.lt.s32.totalorder %s15_s7, %s15_s7 }
   0x9   :  { %p566_p3 = scmp.ne.s32.totalorder %s15_s7, %s565_s15  ;;  %p571_p5 = scmp.lt.s32.totalorder %s565_s15, %s565_s15 }
   0xb   :  { %p572_p6 = por %p571_p5, %p570_p4 }
   0xd   :  { %p573_p7 = pnand %p572_p6, %p566_p3 }
   0xf   :  { %576 = shalt.err (!%p573_p7)
}
  0x10   :  { %17 = dma.hbm_to_vmem [thread:$0]  %s771_s0, 128, %s15_s7, [#allocation3]  }
  0x11   :  { %599 = dma.done.wait [#allocation3], 128  }
  0x12   :  { %600 = vsyncadd [#allocation3], 4294967168  ;;  %v604_v0 = vmov 2   ;;  %v605_v1 = vmov 0   ;;  %v665_v2 = vld [vmem:[#allocation2] sm:$0xff]  ;;  %v606_v3 = vmov 3   ;;  %v23_v21 = vlaneseq }
  0x13   :  { %522 = vset.pattern.permute.xlu1 %v604_v0  ;;  %520 = vset.pattern.permute.xlu0 %v605_v1  ;;  %v607_v4 = vmov 1   ;;  %v608_v5 = vmov 4   ;;  %v609_v6 = vmov 5   ;;  %v610_v7 = vmov 6   ;;  %s637_s0 = smov 376   ;;  %s638_s18 = smov 368  }
  0x14   :  { %72 = vperm.xlu1 %522, %v665_v2   ;;  %54 = vperm.xlu0 %520, %v665_v2   ;;  %v611_v8 = vmov 8   ;;  %v612_v9 = vmov 7   ;;  %v613_v10 = vmov 11   ;;  %v614_v11 = vmov 9   ;;  %s639_s19 = smov [#allocation5]  }
  0x15   :  { %v615_v12 = vmov 14   ;;  %v616_v13 = vmov 10   ;;  %v617_v14 = vmov 17   ;;  %v618_v15 = vmov 12   ;;  %s466_s20 = sshll.u32 %s639_s19, 4  ;;  %s467_s20 = int_to_ptr.vmem [resolvable:$true] %s466_s20 }
  0x16   :  { %v619_v16 = vmov 20   ;;  %v620_v17 = vmov 13   ;;  %v621_v18 = vmov 23   ;;  %v622_v19 = vmov 15   ;;  %s577_s21 = scalar_lea.vmem %s467_s20, 2048  ;;  %p582_p9 = scmp.lt.s32.totalorder %s467_s20, %s467_s20 }
  0x17   :  { %v623_v20 = vmov 26   ;;  %v624_v22 = vmov 16   ;;  %v625_v23 = vmov 29   ;;  %v24_v24 = vand.u32 127, %v23_v21  ;;  %p578_p8 = scmp.ne.s32.totalorder %s467_s20, %s577_s21  ;;  %p583_p10 = scmp.lt.s32.totalorder %s577_s21, %s577_s21 }
  0x18   :  { %523 = vset.pattern.permute.xlu1 %v606_v3  ;;  %521 = vset.pattern.permute.xlu0 %v607_v4  ;;  %v626_v26 = vmov 18   ;;  %v627_v27 = vmov 31   ;;  %v628_v29 = vmov 19   ;;  %v629_v31 = vmov 21  }
  0x19   :  { %81 = vperm.xlu1 %523, %v665_v2   ;;  %63 = vperm.xlu0 %521, %v665_v2   ;;  %v28_v25 = vadd.s32 4294967280, %v24_v24  ;;  %v630_v33 = vmov 22   ;;  %v631_v35 = vmov 24   ;;  %v632_v37 = vmov 25   ;;  %p584_p11 = por %p583_p10, %p582_p9 }
  0x1a   :  { %v633_v38 = vmov 27   ;;  %v634_v39 = vmov 28   ;;  %v635_v42 = vmov 30  }
  0x1b   :  { %v29_v28 = vsub.s32 0, %v28_v25  ;;  %p585_p12 = pnand %p584_p11, %p578_p8 }
  0x1d   :  { %524 = vset.pattern.permute.xlu1 %v608_v5  ;;  %525 = vset.pattern.permute.xlu0 %v609_v6  ;;  %v32_v30 = vsub.s32 0, %v29_v28  ;;  %vm30_vm2 = vcmp.lt.s32.totalorder %v29_v28, 0 }
  0x1e   :  { %90 = vperm.xlu1 %524, %v665_v2   ;;  %99 = vperm.xlu0 %525, %v665_v2   ;;  %v31_v49 = vsel %vm30_vm2, 16, %v605_v1 }
  0x1f   :  { %v693_v32 = vmin.u32 %v32_v30, %v29_v28 }
  0x21   :  { %vm35_vm0 = vcmp.gt.s32.totalorder %v693_v32, 1  ;;  %vm34_vm3 = vcmp.lt.s32.totalorder %v693_v32, 8 }
  0x22   :  { %526 = vset.pattern.permute.xlu1 %v610_v7  ;;  %528 = vset.pattern.permute.xlu0 %v611_v8  ;;  %v36_v34 = vsel %vm35_vm0, %v693_v32, 1 }
  0x23   :  { %108 = vperm.xlu1 %526, %v665_v2   ;;  %126 = vperm.xlu0 %528, %v665_v2   ;;  %v37_v36 = vcvt.s32.f32 %v36_v34 }
  0x25   :  { %553 = vlog2.f32 %v37_v36 }
  0x27   :  { %527 = vset.pattern.permute.xlu1 %v612_v9  ;;  %531 = vset.pattern.permute.xlu0 %v613_v10 }
  0x28   :  { %117 = vperm.xlu1 %527, %v665_v2   ;;  %153 = vperm.xlu0 %531, %v665_v2  }
  0x2c   :  { %529 = vset.pattern.permute.xlu1 %v614_v11  ;;  %534 = vset.pattern.permute.xlu0 %v615_v12 }
  0x2d   :  { %135 = vperm.xlu1 %529, %v665_v2   ;;  %180 = vperm.xlu0 %534, %v665_v2  }
  0x2f   :  { %v554_v40 = vpop.eup %553 }
  0x30   :  { %v39_v41 = vmul.f32 0.6931472, %v554_v40 }
  0x31   :  { %530 = vset.pattern.permute.xlu1 %v616_v13  ;;  %537 = vset.pattern.permute.xlu0 %v617_v14 }
  0x32   :  { %144 = vperm.xlu1 %530, %v665_v2   ;;  %207 = vperm.xlu0 %537, %v665_v2   ;;  %v40_v43 = vmul.f32 2.88539, %v39_v41 }
  0x34   :  { %v41_v44 = vadd.f32 -6.0, %v40_v43 }
  0x36   :  { %532 = vset.pattern.permute.xlu1 %v618_v15  ;;  %540 = vset.pattern.permute.xlu0 %v619_v16  ;;  %v479_v45 = vtrunc.f32 %v41_v44 }
  0x37   :  { %162 = vperm.xlu1 %532, %v665_v2   ;;  %234 = vperm.xlu0 %540, %v665_v2  }
  0x38   :  { %v480_v46 = vcvt.f32.s32 %v479_v45 }
  0x3a   :  { %v43_v47 = vadd.s32 8, %v480_v46 }
  0x3b   :  { %533 = vset.pattern.permute.xlu1 %v620_v17  ;;  %543 = vset.pattern.permute.xlu0 %v621_v18 }
  0x3c   :  { %171 = vperm.xlu1 %533, %v665_v2   ;;  %261 = vperm.xlu0 %543, %v665_v2   ;;  %vm44_vm1 = vcmp.lt.s32.totalorder %v43_v47, 15 }
  0x3d   :  { %v45_v48 = vsel %vm44_vm1, %v43_v47, 15 }
  0x3e   :  { %v46_v50 = vsel %vm34_vm3, %v693_v32, %v45_v48 }
  0x3f   :  { %v707_v51 = vadd.s32 %v46_v50, %v31_v49 }
  0x40   :  { %535 = vset.pattern.permute.xlu1 %v622_v19  ;;  %546 = vset.pattern.permute.xlu0 %v623_v20 }
  0x41   :  { %189 = vperm.xlu1 %535, %v665_v2   ;;  %288 = vperm.xlu0 %546, %v665_v2   ;;  %vm49_vm4 = vcmp.eq.s32.totalorder %v707_v51, 0  ;;  %vm59_vm5 = vcmp.eq.s32.totalorder %v707_v51, 1  ;;  %vm68_vm6 = vcmp.eq.s32.totalorder %v707_v51, 2  ;;  %vm77_vm7 = vcmp.eq.s32.totalorder %v707_v51, 3 }
  0x42   :  { %vm86_vm8 = vcmp.eq.s32.totalorder %v707_v51, 4  ;;  %vm95_vm9 = vcmp.eq.s32.totalorder %v707_v51, 5  ;;  %vm104_vm10 = vcmp.eq.s32.totalorder %v707_v51, 6  ;;  %vm113_vm11 = vcmp.eq.s32.totalorder %v707_v51, 7 }
  0x43   :  { %vm122_vm12 = vcmp.eq.s32.totalorder %v707_v51, 8  ;;  %vm131_vm13 = vcmp.eq.s32.totalorder %v707_v51, 9  ;;  %vm140_vm14 = vcmp.eq.s32.totalorder %v707_v51, 10  ;;  %vm149_vm15 = vcmp.eq.s32.totalorder %v707_v51, 11 }
  0x44   :  { %vm158_vm0 = vcmp.eq.s32.totalorder %v707_v51, 12  ;;  %vm167_vm1 = vcmp.eq.s32.totalorder %v707_v51, 13  ;;  %vm176_vm2 = vcmp.eq.s32.totalorder %v707_v51, 14  ;;  %vm185_vm3 = vcmp.eq.s32.totalorder %v707_v51, 15 }
  0x45   :  { %536 = vset.pattern.permute.xlu1 %v624_v22  ;;  %549 = vset.pattern.permute.xlu0 %v625_v23 }
  0x46   :  { %198 = vperm.xlu1 %536, %v665_v2   ;;  %315 = vperm.xlu0 %549, %v665_v2  }
  0x4a   :  { %538 = vset.pattern.permute.xlu1 %v626_v26  ;;  %552 = vset.pattern.permute.xlu0 %v627_v27 }
  0x4b   :  { %216 = vperm.xlu1 %538, %v665_v2  }
  0x4f   :  { %539 = vset.pattern.permute.xlu1 %v628_v29 }
  0x50   :  { %225 = vperm.xlu1 %539, %v665_v2  }
  0x54   :  { %541 = vset.pattern.permute.xlu1 %v629_v31 }
  0x55   :  { %243 = vperm.xlu1 %541, %v665_v2  }
  0x59   :  { %542 = vset.pattern.permute.xlu1 %v630_v33 }
  0x5a   :  { %252 = vperm.xlu1 %542, %v665_v2  }
  0x5e   :  { %544 = vset.pattern.permute.xlu1 %v631_v35 }
  0x5f   :  { %270 = vperm.xlu1 %544, %v665_v2  }
  0x63   :  { %545 = vset.pattern.permute.xlu1 %v632_v37 }
  0x64   :  { %279 = vperm.xlu1 %545, %v665_v2  }
  0x68   :  { %547 = vset.pattern.permute.xlu1 %v633_v38 }
  0x69   :  { %297 = vperm.xlu1 %547, %v665_v2  }
  0x6d   :  { %548 = vset.pattern.permute.xlu1 %v634_v39 }
  0x6e   :  { %306 = vperm.xlu1 %548, %v665_v2  }
  0x72   :  { %550 = vset.pattern.permute.xlu1 %v635_v42 }
  0x73   :  { %324 = vperm.xlu1 %550, %v665_v2  }
  0x77   :  { %551 = vset.pattern.permute.xlu1 %v627_v27 }
  0x78   :  { %333 = vperm.xlu1 %551, %v665_v2  }
  0x93   :  { %v73_v52 = vpop.permute.xlu1 %72  ;;  %v55_v53 = vpop.permute.xlu0 %54 }
  0x94   :  { %v57_v54 = vsel %vm49_vm4, %v55_v53, 0.0  ;;  %v75_v59 = vsel %vm68_vm6, %v73_v52, 0.0  ;;  %vm194_vm4 = vcmp.eq.s32.totalorder %v707_v51, 16  ;;  %vm212_vm6 = vcmp.eq.s32.totalorder %v707_v51, 18 }
  0x98   :  { %v82_v55 = vpop.permute.xlu1 %81  ;;  %v64_v56 = vpop.permute.xlu0 %63 }
  0x99   :  { %v66_v57 = vsel %vm59_vm5, %v64_v56, 0.0  ;;  %v84_v61 = vsel %vm77_vm7, %v82_v55, 0.0  ;;  %vm203_vm5 = vcmp.eq.s32.totalorder %v707_v51, 17  ;;  %vm221_vm7 = vcmp.eq.s32.totalorder %v707_v51, 19 }
  0x9a   :  { %v67_v58 = vadd.f32 %v66_v57, %v57_v54 }
  0x9c   :  { %v76_v60 = vadd.f32 %v75_v59, %v67_v58 }
  0x9d   :  { %v91_v62 = vpop.permute.xlu1 %90  ;;  %v100_v63 = vpop.permute.xlu0 %99 }
  0x9e   :  { %v85_v0 = vadd.f32 %v84_v61, %v76_v60  ;;  %v93_v1 = vsel %vm86_vm8, %v91_v62, 0.0  ;;  %v102_v3 = vsel %vm95_vm9, %v100_v63, 0.0  ;;  %vm230_vm8 = vcmp.eq.s32.totalorder %v707_v51, 20 }
  0x9f   :  { %vm239_vm9 = vcmp.eq.s32.totalorder %v707_v51, 21 }
  0xa0   :  { %v94_v2 = vadd.f32 %v93_v1, %v85_v0 }
  0xa2   :  { %v109_v4 = vpop.permute.xlu1 %108  ;;  %v103_v5 = vadd.f32 %v102_v3, %v94_v2  ;;  %v127_v9 = vpop.permute.xlu0 %126 }
  0xa3   :  { %v111_v6 = vsel %vm104_vm10, %v109_v4, 0.0  ;;  %v129_v12 = vsel %vm122_vm12, %v127_v9, 0.0  ;;  %vm248_vm10 = vcmp.eq.s32.totalorder %v707_v51, 22  ;;  %vm266_vm12 = vcmp.eq.s32.totalorder %v707_v51, 24 }
  0xa4   :  { %v112_v7 = vadd.f32 %v111_v6, %v103_v5 }
  0xa7   :  { %v118_v8 = vpop.permute.xlu1 %117  ;;  %v154_v18 = vpop.permute.xlu0 %153 }
  0xa8   :  { %v120_v10 = vsel %vm113_vm11, %v118_v8, 0.0  ;;  %v156_v22 = vsel %vm149_vm15, %v154_v18, 0.0  ;;  %vm257_vm11 = vcmp.eq.s32.totalorder %v707_v51, 23  ;;  %vm293_vm15 = vcmp.eq.s32.totalorder %v707_v51, 27 }
  0xa9   :  { %v121_v11 = vadd.f32 %v120_v10, %v112_v7 }
  0xab   :  { %v130_v14 = vadd.f32 %v129_v12, %v121_v11 }
  0xac   :  { %v136_v13 = vpop.permute.xlu1 %135  ;;  %v181_v28 = vpop.permute.xlu0 %180 }
  0xad   :  { %v138_v15 = vsel %vm131_vm13, %v136_v13, 0.0  ;;  %v183_v31 = vsel %vm176_vm2, %v181_v28, 0.0  ;;  %vm275_vm13 = vcmp.eq.s32.totalorder %v707_v51, 25  ;;  %vm320_vm2 = vcmp.eq.s32.totalorder %v707_v51, 30 }
  0xae   :  { %v139_v16 = vadd.f32 %v138_v15, %v130_v14 }
  0xb1   :  { %v145_v17 = vpop.permute.xlu1 %144  ;;  %v208_v38 = vpop.permute.xlu0 %207 }
  0xb2   :  { %v147_v19 = vsel %vm140_vm14, %v145_v17, 0.0  ;;  %v210_v41 = vsel %vm203_vm5, %v208_v38, 0.0  ;;  %vm284_vm14 = vcmp.eq.s32.totalorder %v707_v51, 26  ;;  %v342_v17 = vshrl.u32 %v23_v21, 7 }
  0xb3   :  { %v148_v20 = vadd.f32 %v147_v19, %v139_v16  ;;  %vm353_vm5 = vcmask 130048  }
  0xb4   :  { %v373_v28 = vsub.s32 2, %v342_v17 }
  0xb5   :  { %v157_v24 = vadd.f32 %v156_v22, %v148_v20  ;;  %v636_v22 = vmov 0.0  }
  0xb6   :  { %v163_v23 = vpop.permute.xlu1 %162  ;;  %v235_v47 = vpop.permute.xlu0 %234 }
  0xb7   :  { %v165_v25 = vsel %vm158_vm0, %v163_v23, 0.0  ;;  %v237_v50 = vsel %vm230_vm8, %v235_v47, 0.0  ;;  %vm302_vm0 = vcmp.eq.s32.totalorder %v707_v51, 28 }
  0xb8   :  { %v166_v26 = vadd.f32 %v165_v25, %v157_v24  ;;  %v343_v25 = vsub.s32 0, %v342_v17 }
  0xbb   :  { %v172_v27 = vpop.permute.xlu1 %171  ;;  %v262_v57 = vpop.permute.xlu0 %261 }
  0xbc   :  { %v174_v29 = vsel %vm167_vm1, %v172_v27, 0.0  ;;  %v264_v60 = vsel %vm257_vm11, %v262_v57, 0.0  ;;  %vm311_vm1 = vcmp.eq.s32.totalorder %v707_v51, 29  ;;  %v358_v27 = vsub.s32 1, %v342_v17 }
  0xbd   :  { %v175_v30 = vadd.f32 %v174_v29, %v166_v26  ;;  %v388_v29 = vsub.s32 3, %v342_v17 }
  0xbf   :  { %v184_v34 = vadd.f32 %v183_v31, %v175_v30  ;;  %v403_v30 = vsub.s32 4, %v342_v17  ;;  %v418_v31 = vsub.s32 5, %v342_v17 }
  0xc0   :  { %v190_v33 = vpop.permute.xlu1 %189  ;;  %v289_v2 = vpop.permute.xlu0 %288 }
  0xc1   :  { %v192_v35 = vsel %vm185_vm3, %v190_v33, 0.0  ;;  %v291_v5 = vsel %vm284_vm14, %v289_v2, 0.0  ;;  %vm329_vm3 = vcmp.eq.s32.totalorder %v707_v51, 31  ;;  %v433_v33 = vsub.s32 6, %v342_v17 }
  0xc2   :  { %v193_v36 = vadd.f32 %v192_v35, %v184_v34  ;;  %v448_v34 = vsub.s32 7, %v342_v17 }
  0xc5   :  { %v199_v37 = vpop.permute.xlu1 %198  ;;  %v316_v11 = vpop.permute.xlu0 %315 }
  0xc6   :  { %v201_v39 = vsel %vm194_vm4, %v199_v37, 0.0  ;;  %v318_v14 = vsel %vm311_vm1, %v316_v11, 0.0  ;;  %vm338_vm4 = vcmp.gt.s32.totalorder %v693_v32, 20 }
  0xc7   :  { %v202_v40 = vadd.f32 %v201_v39, %v193_v36  ;;  %v339_v23 = vsel %vm338_vm4, -1e+10, %v636_v22 }
  0xc9   :  { %v211_v43 = vadd.f32 %v210_v41, %v202_v40 }
  0xca   :  { %v217_v42 = vpop.permute.xlu1 %216 }
  0xcb   :  { %v219_v44 = vsel %vm212_vm6, %v217_v42, 0.0 }
  0xcc   :  { %v220_v45 = vadd.f32 %v219_v44, %v211_v43 }
  0xcf   :  { %v226_v46 = vpop.permute.xlu1 %225 }
  0xd0   :  { %v228_v48 = vsel %vm221_vm7, %v226_v46, 0.0 }
  0xd1   :  { %v229_v49 = vadd.f32 %v228_v48, %v220_v45 }
  0xd3   :  { %v238_v53 = vadd.f32 %v237_v50, %v229_v49 }
  0xd4   :  { %v244_v52 = vpop.permute.xlu1 %243 }
  0xd5   :  { %v246_v54 = vsel %vm239_vm9, %v244_v52, 0.0 }
  0xd6   :  { %v247_v55 = vadd.f32 %v246_v54, %v238_v53 }
  0xd9   :  { %v253_v56 = vpop.permute.xlu1 %252 }
  0xda   :  { %v255_v58 = vsel %vm248_vm10, %v253_v56, 0.0 }
  0xdb   :  { %v256_v59 = vadd.f32 %v255_v58, %v247_v55 }
  0xdd   :  { %v265_v62 = vadd.f32 %v264_v60, %v256_v59 }
  0xde   :  { %v271_v61 = vpop.permute.xlu1 %270 }
  0xdf   :  { %v273_v63 = vsel %vm266_vm12, %v271_v61, 0.0 }
  0xe0   :  { %v274_v0 = vadd.f32 %v273_v63, %v265_v62 }
  0xe3   :  { %v280_v1 = vpop.permute.xlu1 %279 }
  0xe4   :  { %v282_v3 = vsel %vm275_vm13, %v280_v1, 0.0 }
  0xe5   :  { %v283_v4 = vadd.f32 %v282_v3, %v274_v0 }
  0xe7   :  { %v292_v7 = vadd.f32 %v291_v5, %v283_v4 }
  0xe8   :  { %v298_v6 = vpop.permute.xlu1 %297 }
  0xe9   :  { %v300_v8 = vsel %vm293_vm15, %v298_v6, 0.0 }
  0xea   :  { %v301_v9 = vadd.f32 %v300_v8, %v292_v7 }
  0xed   :  { %v307_v10 = vpop.permute.xlu1 %306 }
  0xee   :  { %v309_v12 = vsel %vm302_vm0, %v307_v10, 0.0 }
  0xef   :  { %v310_v13 = vadd.f32 %v309_v12, %v301_v9 }
  0xf1   :  { %v319_v16 = vadd.f32 %v318_v14, %v310_v13 }
  0xf2   :  { %v325_v15 = vpop.permute.xlu1 %324 }
  0xf3   :  { %v327_v18 = vsel %vm320_vm2, %v325_v15, 0.0 }
  0xf4   :  { %v328_v19 = vadd.f32 %v327_v18, %v319_v16 }
  0xf7   :  { %v334_v20 = vpop.permute.xlu1 %333 }
  0xf8   :  { %v336_v24 = vsel %vm329_vm3, %v334_v20, 0.0 }
  0xf9   :  { %v337_v26 = vadd.f32 %v336_v24, %v328_v19 }
  0xfb   :  { %v340_v21 = vadd.f32 %v339_v23, %v337_v26 }
  0xfd   :  { %v344_v35 = vrot.slane %v340_v21, %v343_v25  ;;  %v359_v36 = vrot.slane %v340_v21, %v358_v27  ;;  %v374_v51 = vrot.slane %v340_v21, %v373_v28  ;;  %v389_v37 = vrot.slane %v340_v21, %v388_v29 }
  0xfe   :  { %v404_v32 = vrot.slane %v340_v21, %v403_v30  ;;  %v419_v38 = vrot.slane %v340_v21, %v418_v31  ;;  %v434_v39 = vrot.slane %v340_v21, %v433_v33  ;;  %v449_v40 = vrot.slane %v340_v21, %v448_v34 }
  0xff   :  { %351 = vrot.lane.b32.xlu1 %v344_v35, %s637_s0  ;;  %347 = vrot.lane.b32.xlu0 %v344_v35, %s638_s18 }
 0x103   :  { %366 = vrot.lane.b32.xlu1 %v359_v36, %s637_s0  ;;  %362 = vrot.lane.b32.xlu0 %v359_v36, %s638_s18 }
 0x107   :  { %381 = vrot.lane.b32.xlu1 %v374_v51, %s637_s0  ;;  %377 = vrot.lane.b32.xlu0 %v374_v51, %s638_s18 }
 0x10b   :  { %396 = vrot.lane.b32.xlu1 %v389_v37, %s637_s0  ;;  %392 = vrot.lane.b32.xlu0 %v389_v37, %s638_s18 }
 0x10f   :  { %411 = vrot.lane.b32.xlu1 %v404_v32, %s637_s0  ;;  %407 = vrot.lane.b32.xlu0 %v404_v32, %s638_s18 }
 0x113   :  { %426 = vrot.lane.b32.xlu1 %v419_v38, %s637_s0  ;;  %422 = vrot.lane.b32.xlu0 %v419_v38, %s638_s18 }
 0x117   :  { %441 = vrot.lane.b32.xlu1 %v434_v39, %s637_s0  ;;  %437 = vrot.lane.b32.xlu0 %v434_v39, %s638_s18 }
 0x11b   :  { %456 = vrot.lane.b32.xlu1 %v449_v40, %s637_s0  ;;  %452 = vrot.lane.b32.xlu0 %v449_v40, %s638_s18 }
 0x171   :  { %v352_v41 = vpop.permute.xlu1 %351  ;;  %v348_v42 = vpop.permute.xlu0 %347 }
 0x172   :  { %355 = vst.msk [vmem:[#allocation5 + $0x8] sm:$0xff] %vm353_vm5, %v352_v41  ;;  %354 = vst.msk [vmem:[#allocation5] sm:$0xff] %vm353_vm5, %v348_v42 }
 0x175   :  { %v367_v43 = vpop.permute.xlu1 %366  ;;  %v363_v44 = vpop.permute.xlu0 %362 }
 0x176   :  { %370 = vst.msk [vmem:[#allocation5 + $0x18] sm:$0xff] %vm353_vm5, %v367_v43  ;;  %369 = vst.msk [vmem:[#allocation5 + $0x10] sm:$0xff] %vm353_vm5, %v363_v44 }
 0x179   :  { %v382_v45 = vpop.permute.xlu1 %381  ;;  %v378_v46 = vpop.permute.xlu0 %377 }
 0x17a   :  { %385 = vst.msk [vmem:[#allocation5 + $0x28] sm:$0xff] %vm353_vm5, %v382_v45  ;;  %384 = vst.msk [vmem:[#allocation5 + $0x20] sm:$0xff] %vm353_vm5, %v378_v46 }
 0x17d   :  { %v397_v47 = vpop.permute.xlu1 %396  ;;  %v393_v48 = vpop.permute.xlu0 %392 }
 0x17e   :  { %400 = vst.msk [vmem:[#allocation5 + $0x38] sm:$0xff] %vm353_vm5, %v397_v47  ;;  %399 = vst.msk [vmem:[#allocation5 + $0x30] sm:$0xff] %vm353_vm5, %v393_v48 }
 0x181   :  { %v412_v49 = vpop.permute.xlu1 %411  ;;  %v408_v50 = vpop.permute.xlu0 %407 }
 0x182   :  { %415 = vst.msk [vmem:[#allocation5 + $0x48] sm:$0xff] %vm353_vm5, %v412_v49  ;;  %414 = vst.msk [vmem:[#allocation5 + $0x40] sm:$0xff] %vm353_vm5, %v408_v50 }
 0x185   :  { %v427_v52 = vpop.permute.xlu1 %426  ;;  %v423_v53 = vpop.permute.xlu0 %422 }
 0x186   :  { %430 = vst.msk [vmem:[#allocation5 + $0x58] sm:$0xff] %vm353_vm5, %v427_v52  ;;  %429 = vst.msk [vmem:[#allocation5 + $0x50] sm:$0xff] %vm353_vm5, %v423_v53 }
 0x189   :  { %v442_v54 = vpop.permute.xlu1 %441  ;;  %v438_v55 = vpop.permute.xlu0 %437 }
 0x18a   :  { %445 = vst.msk [vmem:[#allocation5 + $0x68] sm:$0xff] %vm353_vm5, %v442_v54  ;;  %444 = vst.msk [vmem:[#allocation5 + $0x60] sm:$0xff] %vm353_vm5, %v438_v55 }
 0x18d   :  { %v457_v56 = vpop.permute.xlu1 %456  ;;  %v453_v57 = vpop.permute.xlu0 %452 }
 0x18e   :  { %460 = vst.msk [vmem:[#allocation5 + $0x78] sm:$0xff] %vm353_vm5, %v457_v56  ;;  %459 = vst.msk [vmem:[#allocation5 + $0x70] sm:$0xff] %vm353_vm5, %v453_v57 }
 0x18f   :  { %588 = shalt.err (!%p585_p12)
}
 0x190   :  { %s589_s24 = scalar_lea.hbm %s772_s1, 2048 }
 0x191   :  { %p590_p13 = scmp.ne.s32.totalorder %s772_s1, %s589_s24  ;;  %p593_p0 = scmp.lt.u32.totalorder %s589_s24, %s772_s1 }
 0x193   :  { %p595_p1 = pnand %p593_p0, %p590_p13 }
 0x195   :  { %598 = shalt.err (!%p595_p1)
}
 0x196   :  { %s640_s29 = smov 128   ;;  %s641_s30 = smov 8  }
 0x197   :  { %472 = dma.vmem_to_hbm [thread:$0]  %s467_s20, 2048, %s772_s1, [#allocation4], %s640_s29, %s640_s29, %s641_s30  }
 0x198   :  { %601 = dma.done.wait [#allocation4], 2048  }
 0x199   :  { %602 = vsyncadd [#allocation4], 4294965248 }
 0x19a   :  { %476 = vsyncpa [#allocation3], 1 }
 0x19b   :  { %477 = vsyncpa [#allocation4], 1 }

</bundles_post_ra>
